<compile_context>
chip_gen: v7x
topology: tpu7x:2x2x1
jax: 0.10.0
libtpu: 0.0.40
codegen_flags: <defaults>
</compile_context>

<pallas_src>
import functools

import jax
import jax.numpy as jnp
from jax.experimental import pallas as pl
from jax.experimental.pallas import tpu as pltpu


def _round_up(x, m):
    return (x + m - 1) // m * m


def rbm_sample_h_kernel(v_ref, wt_ref, hb_ref, u_ref, out_ref, acc_ref):
    """One (i, j, k) grid step: accumulate v_tile @ Wt_tile; epilogue on last k."""
    k = pl.program_id(2)

    @pl.when(k == 0)
    def _():
        acc_ref[...] = jnp.zeros_like(acc_ref)

    # MXU matmul: [tb, tk] (bf16) @ [tk, th] (bf16) -> f32 accumulator.
    acc_ref[...] += jnp.dot(
        v_ref[...], wt_ref[...], preferred_element_type=jnp.float32
    )

    @pl.when(k == pl.num_programs(2) - 1)
    def _():
        logits = acc_ref[...] + hb_ref[...]          # broadcast [1, th] bias
        p = jax.nn.sigmoid(logits)                   # EUP transcendental
        # Bernoulli: u ~ U[0,1), sample = 1 with probability p.
        out_ref[...] = (u_ref[...] < p).astype(out_ref.dtype)


@functools.partial(jax.jit, static_argnames=("tb", "th", "tk"))
def rbm_forward(v, W, h_bias, key, *, tb=128, th=128, tk=256):
    """Pallas equivalent of RBM.forward(v) == sample_h(v).

    v:      [B, V] float
    W:      [H, V] float   (torch layout)
    h_bias: [H]    float
    key:    jax PRNG key for the Bernoulli draw.
    Returns [B, H] float32 samples in {0, 1}.
    """
    B, V = v.shape
    H = W.shape[0]

    # Uniforms for the Bernoulli draw, generated once per call.
    u = jax.random.uniform(key, (B, H), dtype=jnp.float32)

    # Shrink tiles for small problems (keep (8, 128) layout granularity).
    tb = min(tb, _round_up(B, 8))
    th = min(th, _round_up(H, 128))
    tk = min(tk, _round_up(V, 128))

    Bp, Hp, Vp = _round_up(B, tb), _round_up(H, th), _round_up(V, tk)

    # Zero-pad to tile multiples. Padded V contributes 0 to the dot product;
    # padded B/H rows/cols are sliced off at the end.
    v_p = jnp.zeros((Bp, Vp), jnp.bfloat16).at[:B, :V].set(v.astype(jnp.bfloat16))
    wt_p = jnp.zeros((Vp, Hp), jnp.bfloat16).at[:V, :H].set(
        W.T.astype(jnp.bfloat16)
    )
    hb_p = jnp.zeros((1, Hp), jnp.float32).at[0, :H].set(h_bias.astype(jnp.float32))
    u_p = jnp.zeros((Bp, Hp), jnp.float32).at[:B, :H].set(u)

    grid = (Bp // tb, Hp // th, Vp // tk)

    bytes_accessed = (
        v_p.size * 2 + wt_p.size * 2 + hb_p.size * 4 + u_p.size * 4 + Bp * Hp * 4
    )

    out = pl.pallas_call(
        rbm_sample_h_kernel,
        out_shape=jax.ShapeDtypeStruct((Bp, Hp), jnp.float32),
        grid_spec=pltpu.PrefetchScalarGridSpec(
            num_scalar_prefetch=0,
            grid=grid,
            in_specs=[
                pl.BlockSpec((tb, tk), lambda i, j, k: (i, k)),   # v tile
                pl.BlockSpec((tk, th), lambda i, j, k: (k, j)),   # W^T tile
                pl.BlockSpec((1, th), lambda i, j, k: (0, j)),    # h_bias tile
                pl.BlockSpec((tb, th), lambda i, j, k: (i, j)),   # uniforms tile
            ],
            out_specs=pl.BlockSpec((tb, th), lambda i, j, k: (i, j)),
            scratch_shapes=[pltpu.VMEM((tb, th), jnp.float32)],
        ),
        compiler_params=pltpu.CompilerParams(
            dimension_semantics=("parallel", "parallel", "arbitrary"),
        ),
        cost_estimate=pl.CostEstimate(
            flops=2 * Bp * Vp * Hp,
            transcendentals=Bp * Hp,
            bytes_accessed=bytes_accessed,
        ),
    )(v_p, wt_p, hb_p, u_p)

    return out[:B, :H]


if __name__ == "__main__":
    key = jax.random.PRNGKey(0)
    k_w, k_v, k_bern = jax.random.split(key, 3)

    batch, visible_dim, hidden_dim = 8, 256, 128

    # Deterministic parameter init (mirrors torch: randn * 0.01, zero biases).
    W = (0.01 * jax.random.normal(k_w, (hidden_dim, visible_dim))).astype(jnp.float32)
    v_bias = jnp.zeros((visible_dim,), jnp.float32)  # unused in forward
    h_bias = jnp.zeros((hidden_dim,), jnp.float32)

    # Binary visible units (typical RBM input).
    v = (jax.random.uniform(k_v, (batch, visible_dim)) < 0.5).astype(jnp.float32)

    h = rbm_forward(v, W, h_bias, k_bern)
    h = jax.block_until_ready(h)

    assert h.shape == (batch, hidden_dim)
    assert h.dtype == jnp.float32
    assert bool(jnp.all((h == 0.0) | (h == 1.0)))  # valid Bernoulli samples

    # Reference check: same uniforms, f32 math. bf16 matmul may flip a sample
    # only when u is within rounding error of p, so require >=95% agreement.
    u_ref = jax.random.uniform(k_bern, (batch, hidden_dim), dtype=jnp.float32)
    p_ref = jax.nn.sigmoid(v @ W.T + h_bias)
    h_ref = (u_ref < p_ref).astype(jnp.float32)
    agree = float(jnp.mean((h == h_ref).astype(jnp.float32)))
    assert agree >= 0.95, f"agreement with reference too low: {agree}"

    print("KERNEL_OK")
</pallas_src>

<mosaic_0001>
module attributes {stable_mosaic.version = 11 : i64} {
  func.func @rbm_sample_h_kernel(%arg0: i32, %arg1: i32, %arg2: i32, %arg3: memref<8x256xbf16, #tpu.memory_space<vmem>>, %arg4: memref<256x128xbf16, #tpu.memory_space<vmem>>, %arg5: memref<1x128xf32, #tpu.memory_space<vmem>>, %arg6: memref<8x128xf32, #tpu.memory_space<vmem>>, %arg7: memref<8x128xf32, #tpu.memory_space<vmem>>, %arg8: memref<8x128xf32, #tpu.memory_space<vmem>>) attributes {dimension_semantics = [#tpu.dimension_semantics<parallel>, #tpu.dimension_semantics<parallel>, #tpu.dimension_semantics<arbitrary>], iteration_bounds = array<i64: 1, 1, 1>, scalar_prefetch = 0 : i64, scratch_operands = 1 : i64, tpu.core_type = #tpu.core_type<tc>, window_params = [{transform_indices = @transform_0, window_bounds = array<i64: 8, 256>}, {transform_indices = @transform_1, window_bounds = array<i64: 256, 128>}, {transform_indices = @transform_2, window_bounds = array<i64: 1, 128>}, {transform_indices = @transform_3, window_bounds = array<i64: 8, 128>}, {transform_indices = @transform_4, window_bounds = array<i64: 8, 128>}]} {
    %c0_i32 = arith.constant 0 : i32
    %0 = arith.cmpi eq, %arg2, %c0_i32 : i32
    %1 = arith.extui %0 : i1 to i32
    %c0_i32_0 = arith.constant 0 : i32
    %2 = arith.cmpi ne, %1, %c0_i32_0 : i32
    scf.if %2 {
      %cst_10 = arith.constant 0.000000e+00 : f32
      %12 = vector.broadcast %cst_10 : f32 to vector<8x128xf32>
      %c0_11 = arith.constant 0 : index
      %c0_12 = arith.constant 0 : index
      %13 = vector.load %arg8[%c0_11, %c0_12] : memref<8x128xf32, #tpu.memory_space<vmem>>, vector<8x128xf32>
      tpu.vector_store %arg8[%c0_11, %c0_12], %12 {strides = array<i32>} : memref<8x128xf32, #tpu.memory_space<vmem>>, vector<8x128xf32>,
    } else {
    }
    %c0 = arith.constant 0 : index
    %c0_1 = arith.constant 0 : index
    %3 = vector.load %arg8[%c0, %c0_1] : memref<8x128xf32, #tpu.memory_space<vmem>>, vector<8x128xf32>
    %c0_2 = arith.constant 0 : index
    %c0_3 = arith.constant 0 : index
    %4 = vector.load %arg3[%c0_2, %c0_3] : memref<8x256xbf16, #tpu.memory_space<vmem>>, vector<8x256xbf16>
    %c0_4 = arith.constant 0 : index
    %c0_5 = arith.constant 0 : index
    %5 = vector.load %arg4[%c0_4, %c0_5] : memref<256x128xbf16, #tpu.memory_space<vmem>>, vector<256x128xbf16>
    %cst = arith.constant dense<0.000000e+00> : vector<8x128xf32>
    %6 = tpu.matmul %4, %5, %cst {dimension_numbers = #tpu.dot_dimension_numbers<[1], [0], [0], [1], [0, 0, 1, 1], [], []>} : vector<8x256xbf16>, vector<256x128xbf16>, vector<8x128xf32> -> vector<8x128xf32>
    %7 = arith.addf %3, %6 : vector<8x128xf32>
    %c0_6 = arith.constant 0 : index
    %c0_7 = arith.constant 0 : index
    %8 = vector.load %arg8[%c0_6, %c0_7] : memref<8x128xf32, #tpu.memory_space<vmem>>, vector<8x128xf32>
    tpu.vector_store %arg8[%c0_6, %c0_7], %7 {strides = array<i32>} : memref<8x128xf32, #tpu.memory_space<vmem>>, vector<8x128xf32>,
    %c0_i32_8 = arith.constant 0 : i32
    %9 = arith.cmpi eq, %arg2, %c0_i32_8 : i32
    %10 = arith.extui %9 : i1 to i32
    %c0_i32_9 = arith.constant 0 : i32
    %11 = arith.cmpi ne, %10, %c0_i32_9 : i32
    scf.if %11 {
      %c0_10 = arith.constant 0 : index
      %c0_11 = arith.constant 0 : index
      %12 = vector.load %arg8[%c0_10, %c0_11] : memref<8x128xf32, #tpu.memory_space<vmem>>, vector<8x128xf32>
      %c0_12 = arith.constant 0 : index
      %c0_13 = arith.constant 0 : index
      %13 = vector.load %arg5[%c0_12, %c0_13] : memref<1x128xf32, #tpu.memory_space<vmem>>, vector<1x128xf32>
      %14 = vector.broadcast %13 : vector<1x128xf32> to vector<8x128xf32>
      %15 = arith.addf %12, %14 : vector<8x128xf32>
      %16 = arith.negf %15 : vector<8x128xf32>
      %17 = math.exp %16 : vector<8x128xf32>
      %cst_14 = arith.constant 1.000000e+00 : f32
      %18 = vector.broadcast %cst_14 : f32 to vector<8x128xf32>
      %19 = arith.addf %18, %17 : vector<8x128xf32>
      %20 = arith.divf %18, %19 : vector<8x128xf32>
      %c0_15 = arith.constant 0 : index
      %c0_16 = arith.constant 0 : index
      %21 = vector.load %arg6[%c0_15, %c0_16] : memref<8x128xf32, #tpu.memory_space<vmem>>, vector<8x128xf32>
      %22 = arith.cmpf olt, %21, %20 : vector<8x128xf32>
      %23 = arith.extui %22 : vector<8x128xi1> to vector<8x128xi32>
      %24 = arith.sitofp %23 : vector<8x128xi32> to vector<8x128xf32>
      %c0_17 = arith.constant 0 : index
      %c0_18 = arith.constant 0 : index
      %25 = vector.load %arg7[%c0_17, %c0_18] : memref<8x128xf32, #tpu.memory_space<vmem>>, vector<8x128xf32>
      tpu.vector_store %arg7[%c0_17, %c0_18], %24 {strides = array<i32>} : memref<8x128xf32, #tpu.memory_space<vmem>>, vector<8x128xf32>,
    } else {
    }
    return
  }
  func.func @transform_0(%arg0: i32, %arg1: i32, %arg2: i32) -> (i32, i32) {
    %c0_i32 = arith.constant 0 : i32
    return %arg0, %arg2 : i32, i32
  }
  func.func @transform_1(%arg0: i32, %arg1: i32, %arg2: i32) -> (i32, i32) {
    %c0_i32 = arith.constant 0 : i32
    return %arg2, %arg1 : i32, i32
  }
  func.func @transform_2(%arg0: i32, %arg1: i32, %arg2: i32) -> (i32, i32) {
    %c0_i32 = arith.constant 0 : i32
    %c0_i32_0 = arith.constant 0 : i32
    return %c0_i32, %arg1 : i32, i32
  }
  func.func @transform_3(%arg0: i32, %arg1: i32, %arg2: i32) -> (i32, i32) {
    %c0_i32 = arith.constant 0 : i32
    return %arg0, %arg1 : i32, i32
  }
  func.func @transform_4(%arg0: i32, %arg1: i32, %arg2: i32) -> (i32, i32) {
    %c0_i32 = arith.constant 0 : i32
    return %arg0, %arg1 : i32, i32
  }
}

</mosaic_0001>

<bundles_post_ra>
// kernel: rbm_forward.1
= control target key start
LH: loop header
LB: loop body
LE: loop exit
PB: predicated region body
PF: predicated region fallthrough
CT: control target
= control target key end

     0   :  { %s427_s0 = inlined_call_operand.vmem [shape: bf16[8,256], index: 0, kind: input, shape index: {}]   ;;  %s428_s1 = inlined_call_operand.vmem [shape: bf16[256,128], index: 1, kind: input, shape index: {}]   ;;  %s429_s2 = inlined_call_operand.vmem [shape: f32[1,128], index: 2, kind: input, shape index: {}]   ;;  %s430_s3 = inlined_call_operand.vmem [shape: f32[8,128], index: 3, kind: input, shape index: {}]   ;;  %s431_s4 = inlined_call_operand.hbm [shape: f32[8,128], index: 4, kind: output, shape index: {}]  }
   0x1   :  { %v285_v0 = vld [vmem:[%s428_s1 + $0x40] sm:$0xff]   ;;  %v287_v2 = vld [vmem:[%s428_s1 + $0x48] sm:$0xff]   ;;  %v289_v4 = vld [vmem:[%s428_s1 + $0x50] sm:$0xff]  }
   0x2   :  { %v286_v1 = vld [vmem:[%s428_s1] sm:$0xff]   ;;  %261 = vmatprep.subr.bf16.mxu0 %v285_v0  ;;  %v288_v3 = vld [vmem:[%s428_s1 + $0x8] sm:$0xff]   ;;  %v290_v5 = vld [vmem:[%s428_s1 + $0x10] sm:$0xff]  }
   0x3   :  { %262 = vmatpush3.bf16.msra.mxu0 %v286_v1  ;;  %v291_v6 = vld [vmem:[%s428_s1 + $0x58] sm:$0xff]   ;;  %v293_v8 = vld [vmem:[%s428_s1 + $0x60] sm:$0xff]   ;;  %v295_v10 = vld [vmem:[%s428_s1 + $0x68] sm:$0xff]  }
   0x4   :  { %263 = vmatprep.subr.bf16.mxu0 %v287_v2  ;;  %v292_v7 = vld [vmem:[%s428_s1 + $0x18] sm:$0xff]   ;;  %v294_v9 = vld [vmem:[%s428_s1 + $0x20] sm:$0xff]  }
   0x5   :  { %v25_v11 = vld [vmem:[%s427_s0] sm:$0xff] }
   0x7   :  { %264 = vmatpush3.bf16.msra.mxu0 %v288_v3 }
   0x8   :  { %265 = vmatprep.subr.bf16.mxu0 %v289_v4 }
   0xb   :  { %266 = vmatpush3.bf16.msra.mxu0 %v290_v5 }
   0xc   :  { %267 = vmatprep.subr.bf16.mxu0 %v291_v6 }
   0xf   :  { %268 = vmatpush3.bf16.msra.mxu0 %v292_v7 }
  0x10   :  { %269 = vmatprep.subr.bf16.mxu0 %v293_v8 }
  0x11   :  { %9 = vsyncpa [#allocation4], 0  ;;  %v241_v12 = vcombine.high %v25_v11, %v25_v11  ;;  %v296_v13 = vld [vmem:[%s428_s1 + $0x28] sm:$0xff]   ;;  %v297_v14 = vld [vmem:[%s428_s1 + $0x70] sm:$0xff]   ;;  %v240_v18 = vcombine.low %v25_v11, %v25_v11  ;;  %s331_s25 = smov [#allocation3]   ;;  %v332_v31 = vmov 0.0  }
  0x12   :  { %v298_v15 = vld [vmem:[%s428_s1 + $0x30] sm:$0xff]   ;;  %v299_v16 = vld [vmem:[%s428_s1 + $0x78] sm:$0xff]   ;;  %v258_v21 = vld [vmem:[%s429_s2] ss:$0 sm:$0xff]  ;;  %s232_s26 = sshll.u32 %s331_s25, 4  ;;  %s233_s26 = int_to_ptr.vmem [resolvable:$true] %s232_s26 }
  0x13   :  { %270 = vmatpush3.bf16.msra.mxu0 %v294_v9  ;;  %193 = vmatprep.mubr.bf16.mxu0 %v241_v12  ;;  %v300_v17 = vld [vmem:[%s428_s1 + $0x38] sm:$0xff]   ;;  %v221_v29 = vld [vmem:[%s430_s3] sm:$0xff]  ;;  %s307_s2 = scalar_lea.vmem %s233_s26, 128  ;;  %p312_p1 = scmp.lt.s32.totalorder %s233_s26, %s233_s26 }
  0x14   :  { %271 = vmatprep.subr.bf16.mxu0 %v295_v10  ;;  %p308_p0 = scmp.ne.s32.totalorder %s233_s26, %s307_s2  ;;  %p313_p2 = scmp.lt.s32.totalorder %s307_s2, %s307_s2 }
  0x16   :  { %p314_p3 = por %p313_p2, %p312_p1 }
  0x17   :  { %272 = vmatpush3.bf16.msra.mxu0 %v296_v13 }
  0x18   :  { %273 = vmatprep.subr.bf16.mxu0 %v297_v14  ;;  %p315_p4 = pnand %p314_p3, %p308_p0 }
  0x1b   :  { %274 = vmatpush3.bf16.msra.mxu0 %v298_v15 }
  0x1c   :  { %275 = vmatprep.subr.bf16.mxu0 %v299_v16 }
  0x1f   :  { %276 = vmatpush3.bf16.msra.mxu0 %v300_v17 }
  0x22   :  { %194 = vmatmul.mubr.bf16.vlgmr.msra.gmra.mrb[0].mxu0 %v240_v18 }
  0xf5   :  { %v277_v19 = vpop.f32.mrb[0].mxu0 }
  0xf6   :  { %v278_v20 = vpop.f32.mrb[1].mxu0 }
  0xf7   :  { %v279_v22 = vadd.f32 %v278_v20, %v277_v19  ;;  %v280_v23 = vpop.f32.mrb[2].mxu0 }
  0xf8   :  { %v281_v24 = vpop.f32.mrb[3].mxu0 }
  0xf9   :  { %v214_v25 = vadd.f32 %v279_v22, %v258_v21 }
  0xfb   :  { %v259_v26 = vmul.f32 -1.442695, %v214_v25 }
  0xfd   :  { %303 = vpow2.f32 %v259_v26 }
 0x107   :  { %v304_v27 = vpop.eup %303 }
 0x108   :  { %v218_v28 = vadd.f32 1.0, %v304_v27 }
 0x10a   :  { %305 = vrcp.f32 %v218_v28 }
 0x114   :  { %v306_v30 = vpop.eup %305 }
 0x115   :  { %vm222_vm0 = vcmp.lt.f32.partialorder %v221_v29, %v306_v30 }
 0x116   :  { %v260_v32 = vsel %vm222_vm0, 1.0, %v332_v31 }
 0x117   :  { %225 = vst [vmem:[#allocation3] sm:$0xff] %v260_v32 }
 0x118   :  { %318 = shalt.err (!%p315_p4)
}
 0x119   :  { %s319_s29 = scalar_lea.hbm %s431_s4, 128 }
 0x11a   :  { %p320_p5 = scmp.ne.s32.totalorder %s431_s4, %s319_s29  ;;  %p323_p6 = scmp.lt.u32.totalorder %s319_s29, %s431_s4 }
 0x11c   :  { %p325_p7 = pnand %p323_p6, %p320_p5 }
 0x11e   :  { %328 = shalt.err (!%p325_p7)
}
 0x11f   :  { %235 = dma.vmem_to_hbm [thread:$0]  %s233_s26, 128, %s431_s4, [#allocation4]  }
 0x120   :  { %329 = dma.done.wait [#allocation4], 128  }
 0x121   :  { %330 = vsyncadd [#allocation4], 4294967168 }
 0x122   :  { %239 = vsyncpa [#allocation4], 1 }

</bundles_post_ra>
